<compile_context>
chip_gen: v7x
topology: tpu7x:2x2x1
jax: 0.10.0
libtpu: 0.0.40
codegen_flags: <defaults>
</compile_context>

<pallas_src>
import jax
import jax.numpy as jnp
from jax.experimental import pallas as pl
from jax.experimental.pallas import tpu as pltpu

_MIB = 1024 * 1024


def _round_up(x, m):
    return ((x + m - 1) // m) * m


def _autofill_kernel(x_ref, w1_ref, b1_ref, wh_ref, bh_ref, out_ref):
    # x_ref:  [TB, D_in] f32     w1_ref: [D_in, H]  bf16   b1_ref: [1, H] f32
    # wh_ref: [H, C_pad] bf16    bh_ref: [1, C_pad] f32    out_ref: [TB, C_pad]
    x = x_ref[...]
    # Feed the MXU bf16 x bf16 (native on all generations); accumulate in f32.
    h = jnp.dot(x.astype(jnp.bfloat16), w1_ref[...],
                preferred_element_type=jnp.float32) + b1_ref[...]
    h = jnp.maximum(h, 0.0)                          # ReLU in f32 on the VPU
    out = jnp.dot(h.astype(jnp.bfloat16), wh_ref[...],
                  preferred_element_type=jnp.float32) + bh_ref[...]
    out_ref[...] = out.astype(out_ref.dtype)         # bf16 store: 1/2 writeback


def _pick_vmem_limit(needed_bytes):
    """Scale the scoped-VMEM request with the footprint; stay v7x-safe."""
    phys = None
    try:  # 128 MiB on v5e/v6e, 64 MiB on v7x (best effort; optional)
        phys = getattr(pltpu.get_tpu_info(), "vmem_capacity_bytes", None)
    except Exception:
        phys = None
    if not phys:
        phys = 64 * _MIB                             # conservative: assume v7x
    cap = (3 * phys) // 4                            # leave compiler headroom
    return int(min(cap, max(32 * _MIB, 4 * needed_bytes)))


def autofill_fused(x, w1, b1, w_heads, b_heads, *, tb=None,
                   out_dtype=jnp.bfloat16):
    """Fused forward pass; returns fused (lane-padded) logits [B, c_pad]."""
    B, d_in = x.shape
    hidden = w1.shape[1]
    c_total = b_heads.shape[1]

    # --- Pad fused head dim to a lane-dense multiple of 128 (zero columns). --
    c_pad = _round_up(max(c_total, 128), 128)
    if w_heads.shape[1] != c_pad:
        w_heads = jnp.pad(w_heads, ((0, 0), (0, c_pad - w_heads.shape[1])))
        b_heads = jnp.pad(b_heads, ((0, 0), (0, c_pad - b_heads.shape[1])))

    # --- Batch tiling. -------------------------------------------------------
    if tb is None:
        tb = B if B <= 1024 else 1024                # fat tiles for big batches
    if tb >= B:
        # Tiny-batch fast path: one un-pipelined step, full-array blocks,
        # no batch padding, no per-step pipeline bookkeeping.
        tb, b_pad, grid = B, B, (1,)
    else:
        # >= 2 grid steps so v7x can shard the "parallel" batch axis over its
        # two TensorCores; tb multiple of 16 keeps bf16 output blocks aligned
        # to the (16, 128) packed-sublane tile.
        tb = max(16, _round_up(min(tb, max(B // 2, 16)), 16))
        b_pad = _round_up(B, tb)
        grid = (b_pad // tb,)
    x_p = x if b_pad == B else jnp.pad(x, ((0, b_pad - B), (0, 0)))

    out_itemsize = jnp.dtype(out_dtype).itemsize
    w_bytes = (w1.size * w1.dtype.itemsize + b1.size * b1.dtype.itemsize
               + w_heads.size * w_heads.dtype.itemsize
               + b_heads.size * b_heads.dtype.itemsize)
    tile_bytes = tb * (d_in * x.dtype.itemsize + c_pad * out_itemsize)

    cost = pl.CostEstimate(
        flops=2 * b_pad * (d_in * hidden + hidden * c_pad),
        transcendentals=0,
        bytes_accessed=(x_p.size * x_p.dtype.itemsize + w_bytes
                        + b_pad * c_pad * out_itemsize),
    )
    params = pltpu.CompilerParams(
        dimension_semantics=("parallel",),           # v7x: shard batch over TCs
        vmem_limit_bytes=_pick_vmem_limit(2 * tile_bytes + 2 * w_bytes),
    )

    def run(single_buffer_resident):
        # Grid-invariant weights/biases: same block every step -> resident in
        # VMEM (DMA'd once).  Single-buffer them when supported: they never
        # change, so double-buffering only wastes VMEM (matters on v7x).
        res_kw = ({"pipeline_mode": pl.Buffered(1)}
                  if single_buffer_resident else {})
        resident = lambda shape: pl.BlockSpec(shape, lambda i: (0, 0), **res_kw)
        return pl.pallas_call(
            _autofill_kernel,
            out_shape=jax.ShapeDtypeStruct((b_pad, c_pad), out_dtype),
            grid_spec=pl.GridSpec(
                grid=grid,
                in_specs=[
                    pl.BlockSpec((tb, d_in), lambda i: (i, 0)),   # batch tile
                    resident(w1.shape),
                    resident(b1.shape),
                    resident(w_heads.shape),
                    resident(b_heads.shape),
                ],
                out_specs=pl.BlockSpec((tb, c_pad), lambda i: (i, 0)),
            ),
            compiler_params=params,
            cost_estimate=cost,
        )(x_p, w1, b1, w_heads, b_heads)

    try:
        out = run(True)
    except Exception:        # pipeline_mode / Buffered(1) unsupported -> default
        out = run(False)

    return out[:B] if b_pad != B else out


def split_heads(fused, head_sizes):
    """Slice per-head logits lazily at the consumer (fused stays lane-dense)."""
    preds, off = [], 0
    for n in head_sizes:
        preds.append(fused[:, off:off + n])
        off += n
    return tuple(preds)


def autofill_forward(x, w1, b1, w_heads, b_heads, head_sizes, *, tb=None,
                     out_dtype=jnp.bfloat16):
    """Full AutoFillModel forward: returns the 11 per-head logit arrays."""
    fused = autofill_fused(x, w1, b1, w_heads, b_heads, tb=tb,
                           out_dtype=out_dtype)
    return split_heads(fused, head_sizes)


def _linear_init(key, fan_in, fan_out):
    """nn.Linear-style init (uniform +-1/sqrt(fan_in)); W as [in, out]."""
    kw, kb = jax.random.split(key)
    bound = 1.0 / jnp.sqrt(jnp.asarray(fan_in, jnp.float32))
    w = jax.random.uniform(kw, (fan_in, fan_out), jnp.float32, -bound, bound)
    b = jax.random.uniform(kb, (1, fan_out), jnp.float32, -bound, bound)
    return w, b


if __name__ == "__main__":
    batch = 16
    input_size = 32
    hidden_size = 32
    head_sizes = (
        5,   # num_type_classes
        7,   # num_subtype_classes
        3,   # num_format_classes
        6,   # num_deptname_classes
        4,   # num_country_classes
        5,   # num_area_classes
        8,   # num_city_classes
        6,   # num_state_classes
        9,   # num_product_classes
        4,   # num_currency_classes
        10,  # num_oid_classes
    )

    key = jax.random.PRNGKey(0)
    keys = jax.random.split(key, 2 + len(head_sizes))

    x = jax.random.normal(keys[0], (batch, input_size), jnp.float32)

    w1_f32, b1 = _linear_init(keys[1], input_size, hidden_size)
    w1 = w1_f32.astype(jnp.bfloat16)

    head_ws, head_bs = [], []
    for i, n in enumerate(head_sizes):
        w, b = _linear_init(keys[2 + i], hidden_size, n)
        head_ws.append(w)
        head_bs.append(b)
    w_heads = jnp.concatenate(head_ws, axis=1).astype(jnp.bfloat16)  # [H, C]
    b_heads = jnp.concatenate(head_bs, axis=1)                       # [1, C] f32

    # Reference in plain JAX with the same math the kernel does
    # (bf16 matmul inputs, f32 accumulation); kernel output is bf16-stored,
    # so allow bf16-level tolerance.
    h_ref = jnp.maximum(
        jnp.dot(x.astype(jnp.bfloat16), w1,
                preferred_element_type=jnp.float32) + b1, 0.0)
    out_ref = jnp.dot(h_ref.astype(jnp.bfloat16), w_heads,
                      preferred_element_type=jnp.float32) + b_heads

    def assert_close(preds, ref, rows):
        off = 0
        for p, n in zip(preds, head_sizes):
            assert p.shape == (rows, n), p.shape
            assert jnp.allclose(p.astype(jnp.float32), ref[:, off:off + n],
                                atol=5e-2, rtol=5e-2), "mismatch"
            off += n

    # 1) Tiny-batch fast path: single un-pipelined step, full-array blocks.
    preds = autofill_forward(x, w1, b1, w_heads, b_heads, head_sizes)
    preds = jax.block_until_ready(preds)
    assert_close(preds, out_ref, batch)

    # 2) Tiled path: 3 grid steps exercise batch tiling / padding / pipelining.
    x_big = jnp.tile(x, (3, 1))
    out_ref_big = jnp.tile(out_ref, (3, 1))
    preds_big = autofill_forward(x_big, w1, b1, w_heads, b_heads, head_sizes,
                                 tb=16)
    preds_big = jax.block_until_ready(preds_big)
    assert_close(preds_big, out_ref_big, 3 * batch)

    print("KERNEL_OK")
</pallas_src>

<mosaic_0001>
module attributes {stable_mosaic.version = 11 : i64} {
  func.func @_autofill_kernel(%arg0: i32, %arg1: memref<16x32xf32, #tpu.memory_space<vmem>>, %arg2: memref<32x32xbf16, #tpu.memory_space<vmem>>, %arg3: memref<1x32xf32, #tpu.memory_space<vmem>>, %arg4: memref<32x128xbf16, #tpu.memory_space<vmem>>, %arg5: memref<1x128xf32, #tpu.memory_space<vmem>>, %arg6: memref<16x128xbf16, #tpu.memory_space<vmem>>) attributes {dimension_semantics = [#tpu.dimension_semantics<parallel>], iteration_bounds = array<i64: 1>, scalar_prefetch = 0 : i64, scratch_operands = 0 : i64, tpu.core_type = #tpu.core_type<tc>, window_params = [{transform_indices = @transform_0, window_bounds = array<i64: 16, 32>}, {pipeline_mode = #tpu.pipeline_mode<synchronous>, transform_indices = @transform_1, window_bounds = array<i64: 32, 32>}, {pipeline_mode = #tpu.pipeline_mode<synchronous>, transform_indices = @transform_2, window_bounds = array<i64: 1, 32>}, {pipeline_mode = #tpu.pipeline_mode<synchronous>, transform_indices = @transform_3, window_bounds = array<i64: 32, 128>}, {pipeline_mode = #tpu.pipeline_mode<synchronous>, transform_indices = @transform_4, window_bounds = array<i64: 1, 128>}, {transform_indices = @transform_5, window_bounds = array<i64: 16, 128>}]} {
    %c0 = arith.constant 0 : index
    %c0_0 = arith.constant 0 : index
    %0 = vector.load %arg1[%c0, %c0_0] : memref<16x32xf32, #tpu.memory_space<vmem>>, vector<16x32xf32>
    %1 = arith.truncf %0 : vector<16x32xf32> to vector<16x32xbf16>
    %c0_1 = arith.constant 0 : index
    %c0_2 = arith.constant 0 : index
    %2 = vector.load %arg2[%c0_1, %c0_2] : memref<32x32xbf16, #tpu.memory_space<vmem>>, vector<32x32xbf16>
    %cst = arith.constant dense<0.000000e+00> : vector<16x32xf32>
    %3 = tpu.matmul %1, %2, %cst {dimension_numbers = #tpu.dot_dimension_numbers<[1], [0], [0], [1], [0, 0, 1, 1], [], []>} : vector<16x32xbf16>, vector<32x32xbf16>, vector<16x32xf32> -> vector<16x32xf32>
    %c0_3 = arith.constant 0 : index
    %c0_4 = arith.constant 0 : index
    %4 = vector.load %arg3[%c0_3, %c0_4] : memref<1x32xf32, #tpu.memory_space<vmem>>, vector<1x32xf32>
    %5 = vector.broadcast %4 : vector<1x32xf32> to vector<16x32xf32>
    %6 = arith.addf %3, %5 : vector<16x32xf32>
    %cst_5 = arith.constant 0.000000e+00 : f32
    %7 = vector.broadcast %cst_5 : f32 to vector<16x32xf32>
    %8 = arith.maximumf %6, %7 : vector<16x32xf32>
    %9 = arith.truncf %8 : vector<16x32xf32> to vector<16x32xbf16>
    %c0_6 = arith.constant 0 : index
    %c0_7 = arith.constant 0 : index
    %10 = vector.load %arg4[%c0_6, %c0_7] : memref<32x128xbf16, #tpu.memory_space<vmem>>, vector<32x128xbf16>
    %cst_8 = arith.constant dense<0.000000e+00> : vector<16x128xf32>
    %11 = tpu.matmul %9, %10, %cst_8 {dimension_numbers = #tpu.dot_dimension_numbers<[1], [0], [0], [1], [0, 0, 1, 1], [], []>} : vector<16x32xbf16>, vector<32x128xbf16>, vector<16x128xf32> -> vector<16x128xf32>
    %c0_9 = arith.constant 0 : index
    %c0_10 = arith.constant 0 : index
    %12 = vector.load %arg5[%c0_9, %c0_10] : memref<1x128xf32, #tpu.memory_space<vmem>>, vector<1x128xf32>
    %13 = vector.broadcast %12 : vector<1x128xf32> to vector<16x128xf32>
    %14 = arith.addf %11, %13 : vector<16x128xf32>
    %15 = arith.truncf %14 : vector<16x128xf32> to vector<16x128xbf16>
    %c0_11 = arith.constant 0 : index
    %c0_12 = arith.constant 0 : index
    %16 = vector.load %arg6[%c0_11, %c0_12] : memref<16x128xbf16, #tpu.memory_space<vmem>>, vector<16x128xbf16>
    tpu.vector_store %arg6[%c0_11, %c0_12], %15 {strides = array<i32>} : memref<16x128xbf16, #tpu.memory_space<vmem>>, vector<16x128xbf16>,
    return
  }
  func.func @transform_0(%arg0: i32) -> (i32, i32) {
    %c0_i32 = arith.constant 0 : i32
    %c0_i32_0 = arith.constant 0 : i32
    return %arg0, %c0_i32 : i32, i32
  }
  func.func @transform_1(%arg0: i32) -> (i32, i32) {
    %c0_i32 = arith.constant 0 : i32
    %c0_i32_0 = arith.constant 0 : i32
    %c0_i32_1 = arith.constant 0 : i32
    return %c0_i32, %c0_i32_0 : i32, i32
  }
  func.func @transform_2(%arg0: i32) -> (i32, i32) {
    %c0_i32 = arith.constant 0 : i32
    %c0_i32_0 = arith.constant 0 : i32
    %c0_i32_1 = arith.constant 0 : i32
    return %c0_i32, %c0_i32_0 : i32, i32
  }
  func.func @transform_3(%arg0: i32) -> (i32, i32) {
    %c0_i32 = arith.constant 0 : i32
    %c0_i32_0 = arith.constant 0 : i32
    %c0_i32_1 = arith.constant 0 : i32
    return %c0_i32, %c0_i32_0 : i32, i32
  }
  func.func @transform_4(%arg0: i32) -> (i32, i32) {
    %c0_i32 = arith.constant 0 : i32
    %c0_i32_0 = arith.constant 0 : i32
    %c0_i32_1 = arith.constant 0 : i32
    return %c0_i32, %c0_i32_0 : i32, i32
  }
  func.func @transform_5(%arg0: i32) -> (i32, i32) {
    %c0_i32 = arith.constant 0 : i32
    %c0_i32_0 = arith.constant 0 : i32
    return %arg0, %c0_i32 : i32, i32
  }
}

module attributes {stable_mosaic.version = 11 : i64} {
  func.func @_autofill_kernel(%arg0: i32, %arg1: memref<16x32xf32, #tpu.memory_space<vmem>>, %arg2: memref<32x32xbf16, #tpu.memory_space<vmem>>, %arg3: memref<1x32xf32, #tpu.memory_space<vmem>>, %arg4: memref<32x128xbf16, #tpu.memory_space<vmem>>, %arg5: memref<1x128xf32, #tpu.memory_space<vmem>>, %arg6: memref<16x128xbf16, #tpu.memory_space<vmem>>) attributes {dimension_semantics = [#tpu.dimension_semantics<parallel>], iteration_bounds = array<i64: 1>, scalar_prefetch = 0 : i64, scratch_operands = 0 : i64, tpu.core_type = #tpu.core_type<tc>, window_params = [{transform_indices = @transform_0, window_bounds = array<i64: 16, 32>}, {pipeline_mode = #tpu.pipeline_mode<synchronous>, transform_indices = @transform_1, window_bounds = array<i64: 32, 32>}, {pipeline_mode = #tpu.pipeline_mode<synchronous>, transform_indices = @transform_2, window_bounds = array<i64: 1, 32>}, {pipeline_mode = #tpu.pipeline_mode<synchronous>, transform_indices = @transform_3, window_bounds = array<i64: 32, 128>}, {pipeline_mode = #tpu.pipeline_mode<synchronous>, transform_indices = @transform_4, window_bounds = array<i64: 1, 128>}, {transform_indices = @transform_5, window_bounds = array<i64: 16, 128>}]} {
    %c0 = arith.constant 0 : index
    %c0_0 = arith.constant 0 : index
    %0 = vector.load %arg1[%c0, %c0_0] : memref<16x32xf32, #tpu.memory_space<vmem>>, vector<16x32xf32>
    %1 = arith.truncf %0 : vector<16x32xf32> to vector<16x32xbf16>
    %c0_1 = arith.constant 0 : index
    %c0_2 = arith.constant 0 : index
    %2 = vector.load %arg2[%c0_1, %c0_2] : memref<32x32xbf16, #tpu.memory_space<vmem>>, vector<32x32xbf16>
    %cst = arith.constant dense<0.000000e+00> : vector<16x32xf32>
    %3 = tpu.matmul %1, %2, %cst {dimension_numbers = #tpu.dot_dimension_numbers<[1], [0], [0], [1], [0, 0, 1, 1], [], []>} : vector<16x32xbf16>, vector<32x32xbf16>, vector<16x32xf32> -> vector<16x32xf32>
    %c0_3 = arith.constant 0 : index
    %c0_4 = arith.constant 0 : index
    %4 = vector.load %arg3[%c0_3, %c0_4] : memref<1x32xf32, #tpu.memory_space<vmem>>, vector<1x32xf32>
    %5 = vector.broadcast %4 : vector<1x32xf32> to vector<16x32xf32>
    %6 = arith.addf %3, %5 : vector<16x32xf32>
    %cst_5 = arith.constant 0.000000e+00 : f32
    %7 = vector.broadcast %cst_5 : f32 to vector<16x32xf32>
    %8 = arith.maximumf %6, %7 : vector<16x32xf32>
    %9 = arith.truncf %8 : vector<16x32xf32> to vector<16x32xbf16>
    %c0_6 = arith.constant 0 : index
    %c0_7 = arith.constant 0 : index
    %10 = vector.load %arg4[%c0_6, %c0_7] : memref<32x128xbf16, #tpu.memory_space<vmem>>, vector<32x128xbf16>
    %cst_8 = arith.constant dense<0.000000e+00> : vector<16x128xf32>
    %11 = tpu.matmul %9, %10, %cst_8 {dimension_numbers = #tpu.dot_dimension_numbers<[1], [0], [0], [1], [0, 0, 1, 1], [], []>} : vector<16x32xbf16>, vector<32x128xbf16>, vector<16x128xf32> -> vector<16x128xf32>
    %c0_9 = arith.constant 0 : index
    %c0_10 = arith.constant 0 : index
    %12 = vector.load %arg5[%c0_9, %c0_10] : memref<1x128xf32, #tpu.memory_space<vmem>>, vector<1x128xf32>
    %13 = vector.broadcast %12 : vector<1x128xf32> to vector<16x128xf32>
    %14 = arith.addf %11, %13 : vector<16x128xf32>
    %15 = arith.truncf %14 : vector<16x128xf32> to vector<16x128xbf16>
    %c0_11 = arith.constant 0 : index
    %c0_12 = arith.constant 0 : index
    %16 = vector.load %arg6[%c0_11, %c0_12] : memref<16x128xbf16, #tpu.memory_space<vmem>>, vector<16x128xbf16>
    tpu.vector_store %arg6[%c0_11, %c0_12], %15 {strides = array<i32>} : memref<16x128xbf16, #tpu.memory_space<vmem>>, vector<16x128xbf16>,
    return
  }
  func.func @transform_0(%arg0: i32) -> (i32, i32) {
    %c0_i32 = arith.constant 0 : i32
    %c0_i32_0 = arith.constant 0 : i32
    return %arg0, %c0_i32 : i32, i32
  }
  func.func @transform_1(%arg0: i32) -> (i32, i32) {
    %c0_i32 = arith.constant 0 : i32
    %c0_i32_0 = arith.constant 0 : i32
    %c0_i32_1 = arith.constant 0 : i32
    return %c0_i32, %c0_i32_0 : i32, i32
  }
  func.func @transform_2(%arg0: i32) -> (i32, i32) {
    %c0_i32 = arith.constant 0 : i32
    %c0_i32_0 = arith.constant 0 : i32
    %c0_i32_1 = arith.constant 0 : i32
    return %c0_i32, %c0_i32_0 : i32, i32
  }
  func.func @transform_3(%arg0: i32) -> (i32, i32) {
    %c0_i32 = arith.constant 0 : i32
    %c0_i32_0 = arith.constant 0 : i32
    %c0_i32_1 = arith.constant 0 : i32
    return %c0_i32, %c0_i32_0 : i32, i32
  }
  func.func @transform_4(%arg0: i32) -> (i32, i32) {
    %c0_i32 = arith.constant 0 : i32
    %c0_i32_0 = arith.constant 0 : i32
    %c0_i32_1 = arith.constant 0 : i32
    return %c0_i32, %c0_i32_0 : i32, i32
  }
  func.func @transform_5(%arg0: i32) -> (i32, i32) {
    %c0_i32 = arith.constant 0 : i32
    %c0_i32_0 = arith.constant 0 : i32
    return %arg0, %c0_i32 : i32, i32
  }
}

</mosaic_0001>

<bundles_post_ra>
// kernel: tpu_custom_call.1
= control target key start
LH: loop header
LB: loop body
LE: loop exit
PB: predicated region body
PF: predicated region fallthrough
CT: control target
= control target key end

     0   :  { %10 = vsyncpa [#allocation3], 0  ;;  %s484_s0 = inlined_call_operand.hbm [shape: f32[16,32], index: 0, kind: input, shape index: {}]   ;;  %s485_s1 = inlined_call_operand.hbm [shape: bf16[32,32], index: 1, kind: input, shape index: {}]   ;;  %s486_s2 = inlined_call_operand.vmem [shape: f32[1,32], index: 2, kind: input, shape index: {}]   ;;  %s487_s3 = inlined_call_operand.hbm [shape: bf16[32,128], index: 3, kind: input, shape index: {}]   ;;  %s488_s4 = inlined_call_operand.vmem [shape: f32[1,128], index: 4, kind: input, shape index: {}]   ;;  %s489_s5 = inlined_call_operand.hbm [shape: bf16[16,128], index: 5, kind: output, shape index: {}]  }
   0x1   :  { %11 = vsyncpa [#allocation6], 0 }
   0x2   :  { %12 = vsyncpa [#allocation4], 0  ;;  %s379_s18 = smov [#allocation5]   ;;  %s285_s22 = scalar_lea.hbm %s485_s1, 256 }
   0x3   :  { %s30_s19 = sshll.u32 %s379_s18, 4  ;;  %p286_p0 = scmp.ne.s32.totalorder %s485_s1, %s285_s22  ;;  %s31_s19 = int_to_ptr.vmem [resolvable:$true] %s30_s19 }
   0x4   :  { %p289_p1 = scmp.lt.u32.totalorder %s285_s22, %s485_s1 }
   0x6   :  { %p291_p2 = pnand %p289_p1, %p286_p0 }
   0x8   :  { %294 = shalt.err (!%p291_p2)
}
   0x9   :  { %s295_s27 = scalar_lea.vmem %s31_s19, 256  ;;  %p300_p4 = scmp.lt.s32.totalorder %s31_s19, %s31_s19 }
   0xa   :  { %p296_p3 = scmp.ne.s32.totalorder %s31_s19, %s295_s27  ;;  %p301_p5 = scmp.lt.s32.totalorder %s295_s27, %s295_s27 }
   0xc   :  { %p302_p6 = por %p301_p5, %p300_p4 }
   0xe   :  { %p303_p7 = pnand %p302_p6, %p296_p3 }
  0x10   :  { %306 = shalt.err (!%p303_p7)
}
  0x11   :  { %s380_s28 = smov 64   ;;  %s381_s29 = smov 4  }
  0x12   :  { %36 = dma.hbm_to_vmem [thread:$0]  %s485_s1, 256, %s31_s19, [#allocation6], %s380_s28, %s380_s28, %s381_s29  }
  0x13   :  { %s382_s7 = smov [#allocation2]   ;;  %s307_s11 = scalar_lea.hbm %s484_s0, 256 }
  0x14   :  { %s18_s8 = sshll.u32 %s382_s7, 4  ;;  %p308_p8 = scmp.ne.s32.totalorder %s484_s0, %s307_s11  ;;  %s19_s8 = int_to_ptr.vmem [resolvable:$true] %s18_s8 }
  0x15   :  { %p311_p9 = scmp.lt.u32.totalorder %s307_s11, %s484_s0 }
  0x17   :  { %p313_p10 = pnand %p311_p9, %p308_p8 }
  0x19   :  { %316 = shalt.err (!%p313_p10)
}
  0x1a   :  { %s317_s16 = scalar_lea.vmem %s19_s8, 256  ;;  %p322_p12 = scmp.lt.s32.totalorder %s19_s8, %s19_s8 }
  0x1b   :  { %p318_p11 = scmp.ne.s32.totalorder %s19_s8, %s317_s16  ;;  %p323_p13 = scmp.lt.s32.totalorder %s317_s16, %s317_s16 }
  0x1d   :  { %p324_p0 = por %p323_p13, %p322_p12 }
  0x1f   :  { %p325_p1 = pnand %p324_p0, %p318_p11 }
  0x21   :  { %328 = shalt.err (!%p325_p1)
}
  0x22   :  { %s383_s1 = smov 128   ;;  %s384_s17 = smov 8  }
  0x23   :  { %24 = dma.hbm_to_vmem [thread:$0]  %s484_s0, 256, %s19_s8, [#allocation3], %s383_s1, %s383_s1, %s384_s17  }
  0x24   :  { %s385_s20 = smov [#allocation7]   ;;  %s329_s24 = scalar_lea.hbm %s487_s3, 256 }
  0x25   :  { %s44_s21 = sshll.u32 %s385_s20, 4  ;;  %p330_p2 = scmp.ne.s32.totalorder %s487_s3, %s329_s24  ;;  %s45_s21 = int_to_ptr.vmem [resolvable:$true] %s44_s21 }
  0x26   :  { %p333_p3 = scmp.lt.u32.totalorder %s329_s24, %s487_s3 }
  0x28   :  { %p335_p4 = pnand %p333_p3, %p330_p2 }
  0x2a   :  { %338 = shalt.err (!%p335_p4)
}
  0x2b   :  { %s339_s6 = scalar_lea.vmem %s45_s21, 256  ;;  %p344_p6 = scmp.lt.s32.totalorder %s45_s21, %s45_s21 }
  0x2c   :  { %p340_p5 = scmp.ne.s32.totalorder %s45_s21, %s339_s6  ;;  %p345_p7 = scmp.lt.s32.totalorder %s339_s6, %s339_s6 }
  0x2e   :  { %p346_p8 = por %p345_p7, %p344_p6 }
  0x30   :  { %p347_p9 = pnand %p346_p8, %p340_p5 }
  0x32   :  { %350 = shalt.err (!%p347_p9)
}
  0x33   :  { %50 = dma.hbm_to_vmem [thread:$0]  %s487_s3, 256, %s45_s21, [#allocation6], %s380_s28, %s380_s28, %s381_s29  }
  0x34   :  { %373 = dma.done.wait [#allocation3], 256  }
  0x35   :  { %374 = vsyncadd [#allocation3], 4294967040 }
  0x36   :  { %375 = dma.done.wait [#allocation6], 512  }
  0x37   :  { %376 = vsyncadd [#allocation6], 4294966784  ;;  %v386_v0 = vmov 0.0   ;;  %vm387_vm0 = vmmov 0   ;;  %v281_v1 = vld [vmem:[#allocation5] sm:$0xff]   ;;  %v282_v2 = vld [vmem:[#allocation5 + $0x8] sm:$0xff]  }
  0x38   :  { %255 = vmatprep.subr.bf16.mxu0 %v386_v0  ;;  %259 = vmatprep.mubr.msk.bf16.mxu0 %vm387_vm0, %v386_v0  ;;  %v63_v3 = vld [vmem:[#allocation2] sm:$0xff]  ;;  %v64_v4 = vld [vmem:[#allocation2 + $0x8] sm:$0xff]  ;;  %vm89_vm1 = vcmask 261120   ;;  %s388_s11 = smov [#allocation8]  }
  0x39   :  { %263 = vmatprep.subr.bf16.mxu1 %v386_v0  ;;  %267 = vmatprep.mubr.msk.bf16.mxu1 %vm387_vm0, %v386_v0  ;;  %v65_v5 = vpack.c.bf16 %v64_v4, %v63_v3  ;;  %v283_v6 = vld [vmem:[#allocation7] sm:$0xff]   ;;  %v284_v7 = vld [vmem:[#allocation7 + $0x8] sm:$0xff]  }
  0x3a   :  { %256 = vmatpush3.bf16.msra.mxu0 %v281_v1  ;;  %264 = vmatpush3.bf16.msra.mxu1 %v283_v6  ;;  %v232_v8 = vld [vmem:[%s486_s2] ss:$0 sm:$0xff]  ;;  %s219_s2 = sshll.u32 %s388_s11, 4  ;;  %s220_s2 = int_to_ptr.vmem [resolvable:$true] %s219_s2 }
  0x3b   :  { %257 = vmatprep.subr.bf16.mxu0 %v386_v0  ;;  %265 = vmatprep.subr.bf16.mxu1 %v386_v0  ;;  %v236_v18 = vld [vmem:[%s488_s4] ss:$0 sm:$0xff]  ;;  %s351_s12 = scalar_lea.vmem %s220_s2, 128  ;;  %p356_p11 = scmp.lt.s32.totalorder %s220_s2, %s220_s2 }
  0x3c   :  { %p352_p10 = scmp.ne.s32.totalorder %s220_s2, %s351_s12  ;;  %p357_p12 = scmp.lt.s32.totalorder %s351_s12, %s351_s12 }
  0x3e   :  { %258 = vmatpush3.bf16.msra.mxu0 %v282_v2  ;;  %266 = vmatpush3.bf16.msra.mxu1 %v284_v7  ;;  %p358_p13 = por %p357_p12, %p356_p11 }
  0x40   :  { %p359_p0 = pnand %p358_p13, %p352_p10 }
  0x41   :  { %260 = vmatmul.mubr.msk.bf16.vlgmr.msra.gmra.mrb[0].mxu0 %vm89_vm1, %v65_v5 }
 0x114   :  { %v127_v9 = vpop.f32.mrb[0].mxu0 }
 0x115   :  { %v128_v10 = vadd.f32 %v232_v8, %v127_v9  ;;  %v261_v11 = vpop.f32.mrb[1].mxu0 }
 0x116   :  { %v130_v12 = vpop.f32.mrb[2].mxu0 }
 0x117   :  { %v131_v13 = vadd.f32 %v232_v8, %v130_v12  ;;  %v262_v14 = vpop.f32.mrb[3].mxu0  ;;  %v134_v15 = vmax.f32 %v128_v10, 0.0 }
 0x119   :  { %v135_v16 = vmax.f32 %v131_v13, 0.0 }
 0x11b   :  { %v136_v17 = vpack.c.bf16 %v135_v16, %v134_v15 }
 0x11d   :  { %268 = vmatmul.mubr.msk.bf16.vlgmr.msra.gmra.mrb[0].mxu1 %vm89_vm1, %v136_v17 }
 0x1f0   :  { %v197_v19 = vpop.f32.mrb[0].mxu1 }
 0x1f1   :  { %v269_v20 = vpop.f32.mrb[1].mxu1  ;;  %v198_v22 = vadd.f32 %v236_v18, %v197_v19 }
 0x1f2   :  { %v200_v21 = vpop.f32.mrb[2].mxu1 }
 0x1f3   :  { %v201_v23 = vadd.f32 %v236_v18, %v200_v21  ;;  %v270_v24 = vpop.f32.mrb[3].mxu1 }
 0x1f5   :  { %v247_v25 = vpack.c.bf16 %v201_v23, %v198_v22 }
 0x1f7   :  { %248 = vst [vmem:[#allocation8] sm:$0xff] %v247_v25  }
 0x1f8   :  { %362 = shalt.err (!%p359_p0)
}
 0x1f9   :  { %s363_s14 = scalar_lea.hbm %s489_s5, 128 }
 0x1fa   :  { %p364_p1 = scmp.ne.s32.totalorder %s489_s5, %s363_s14  ;;  %p367_p2 = scmp.lt.u32.totalorder %s363_s14, %s489_s5 }
 0x1fc   :  { %p369_p3 = pnand %p367_p2, %p364_p1 }
 0x1fe   :  { %372 = shalt.err (!%p369_p3)
}
 0x1ff   :  { %225 = dma.vmem_to_hbm [thread:$0]  %s220_s2, 128, %s489_s5, [#allocation4], %s380_s28, %s380_s28, %s381_s29  }
 0x200   :  { %377 = dma.done.wait [#allocation4], 128  }
 0x201   :  { %378 = vsyncadd [#allocation4], 4294967168 }
 0x202   :  { %229 = vsyncpa [#allocation3], 1 }
 0x203   :  { %230 = vsyncpa [#allocation6], 1 }
 0x204   :  { %231 = vsyncpa [#allocation4], 1 }

// kernel: tpu_custom_call.1
= control target key start
LH: loop header
LB: loop body
LE: loop exit
PB: predicated region body
PF: predicated region fallthrough
CT: control target
= control target key end

     0   :  { %10 = vsyncpa [#allocation3], 0  ;;  %s484_s0 = inlined_call_operand.hbm [shape: f32[16,32], index: 0, kind: input, shape index: {}]   ;;  %s485_s1 = inlined_call_operand.hbm [shape: bf16[32,32], index: 1, kind: input, shape index: {}]   ;;  %s486_s2 = inlined_call_operand.vmem [shape: f32[1,32], index: 2, kind: input, shape index: {}]   ;;  %s487_s3 = inlined_call_operand.hbm [shape: bf16[32,128], index: 3, kind: input, shape index: {}]   ;;  %s488_s4 = inlined_call_operand.vmem [shape: f32[1,128], index: 4, kind: input, shape index: {}]   ;;  %s489_s5 = inlined_call_operand.hbm [shape: bf16[16,128], index: 5, kind: output, shape index: {}]  }
   0x1   :  { %11 = vsyncpa [#allocation6], 0 }
   0x2   :  { %12 = vsyncpa [#allocation4], 0  ;;  %s379_s18 = smov [#allocation5]   ;;  %s285_s22 = scalar_lea.hbm %s485_s1, 256 }
   0x3   :  { %s30_s19 = sshll.u32 %s379_s18, 4  ;;  %p286_p0 = scmp.ne.s32.totalorder %s485_s1, %s285_s22  ;;  %s31_s19 = int_to_ptr.vmem [resolvable:$true] %s30_s19 }
   0x4   :  { %p289_p1 = scmp.lt.u32.totalorder %s285_s22, %s485_s1 }
   0x6   :  { %p291_p2 = pnand %p289_p1, %p286_p0 }
   0x8   :  { %294 = shalt.err (!%p291_p2)
}
   0x9   :  { %s295_s27 = scalar_lea.vmem %s31_s19, 256  ;;  %p300_p4 = scmp.lt.s32.totalorder %s31_s19, %s31_s19 }
   0xa   :  { %p296_p3 = scmp.ne.s32.totalorder %s31_s19, %s295_s27  ;;  %p301_p5 = scmp.lt.s32.totalorder %s295_s27, %s295_s27 }
   0xc   :  { %p302_p6 = por %p301_p5, %p300_p4 }
   0xe   :  { %p303_p7 = pnand %p302_p6, %p296_p3 }
  0x10   :  { %306 = shalt.err (!%p303_p7)
}
  0x11   :  { %s380_s28 = smov 64   ;;  %s381_s29 = smov 4  }
  0x12   :  { %36 = dma.hbm_to_vmem [thread:$0]  %s485_s1, 256, %s31_s19, [#allocation6], %s380_s28, %s380_s28, %s381_s29  }
  0x13   :  { %s382_s7 = smov [#allocation2]   ;;  %s307_s11 = scalar_lea.hbm %s484_s0, 256 }
  0x14   :  { %s18_s8 = sshll.u32 %s382_s7, 4  ;;  %p308_p8 = scmp.ne.s32.totalorder %s484_s0, %s307_s11  ;;  %s19_s8 = int_to_ptr.vmem [resolvable:$true] %s18_s8 }
  0x15   :  { %p311_p9 = scmp.lt.u32.totalorder %s307_s11, %s484_s0 }
  0x17   :  { %p313_p10 = pnand %p311_p9, %p308_p8 }
  0x19   :  { %316 = shalt.err (!%p313_p10)
}
  0x1a   :  { %s317_s16 = scalar_lea.vmem %s19_s8, 256  ;;  %p322_p12 = scmp.lt.s32.totalorder %s19_s8, %s19_s8 }
  0x1b   :  { %p318_p11 = scmp.ne.s32.totalorder %s19_s8, %s317_s16  ;;  %p323_p13 = scmp.lt.s32.totalorder %s317_s16, %s317_s16 }
  0x1d   :  { %p324_p0 = por %p323_p13, %p322_p12 }
  0x1f   :  { %p325_p1 = pnand %p324_p0, %p318_p11 }
  0x21   :  { %328 = shalt.err (!%p325_p1)
}
  0x22   :  { %s383_s1 = smov 128   ;;  %s384_s17 = smov 8  }
  0x23   :  { %24 = dma.hbm_to_vmem [thread:$0]  %s484_s0, 256, %s19_s8, [#allocation3], %s383_s1, %s383_s1, %s384_s17  }
  0x24   :  { %s385_s20 = smov [#allocation7]   ;;  %s329_s24 = scalar_lea.hbm %s487_s3, 256 }
  0x25   :  { %s44_s21 = sshll.u32 %s385_s20, 4  ;;  %p330_p2 = scmp.ne.s32.totalorder %s487_s3, %s329_s24  ;;  %s45_s21 = int_to_ptr.vmem [resolvable:$true] %s44_s21 }
  0x26   :  { %p333_p3 = scmp.lt.u32.totalorder %s329_s24, %s487_s3 }
  0x28   :  { %p335_p4 = pnand %p333_p3, %p330_p2 }
  0x2a   :  { %338 = shalt.err (!%p335_p4)
}
  0x2b   :  { %s339_s6 = scalar_lea.vmem %s45_s21, 256  ;;  %p344_p6 = scmp.lt.s32.totalorder %s45_s21, %s45_s21 }
  0x2c   :  { %p340_p5 = scmp.ne.s32.totalorder %s45_s21, %s339_s6  ;;  %p345_p7 = scmp.lt.s32.totalorder %s339_s6, %s339_s6 }
  0x2e   :  { %p346_p8 = por %p345_p7, %p344_p6 }
  0x30   :  { %p347_p9 = pnand %p346_p8, %p340_p5 }
  0x32   :  { %350 = shalt.err (!%p347_p9)
}
  0x33   :  { %50 = dma.hbm_to_vmem [thread:$0]  %s487_s3, 256, %s45_s21, [#allocation6], %s380_s28, %s380_s28, %s381_s29  }
  0x34   :  { %373 = dma.done.wait [#allocation3], 256  }
  0x35   :  { %374 = vsyncadd [#allocation3], 4294967040 }
  0x36   :  { %375 = dma.done.wait [#allocation6], 512  }
  0x37   :  { %376 = vsyncadd [#allocation6], 4294966784  ;;  %v386_v0 = vmov 0.0   ;;  %vm387_vm0 = vmmov 0   ;;  %v281_v1 = vld [vmem:[#allocation5] sm:$0xff]   ;;  %v282_v2 = vld [vmem:[#allocation5 + $0x8] sm:$0xff]  }
  0x38   :  { %255 = vmatprep.subr.bf16.mxu0 %v386_v0  ;;  %259 = vmatprep.mubr.msk.bf16.mxu0 %vm387_vm0, %v386_v0  ;;  %v63_v3 = vld [vmem:[#allocation2] sm:$0xff]  ;;  %v64_v4 = vld [vmem:[#allocation2 + $0x8] sm:$0xff]  ;;  %vm89_vm1 = vcmask 261120   ;;  %s388_s11 = smov [#allocation8]  }
  0x39   :  { %263 = vmatprep.subr.bf16.mxu1 %v386_v0  ;;  %267 = vmatprep.mubr.msk.bf16.mxu1 %vm387_vm0, %v386_v0  ;;  %v65_v5 = vpack.c.bf16 %v64_v4, %v63_v3  ;;  %v283_v6 = vld [vmem:[#allocation7] sm:$0xff]   ;;  %v284_v7 = vld [vmem:[#allocation7 + $0x8] sm:$0xff]  }
  0x3a   :  { %256 = vmatpush3.bf16.msra.mxu0 %v281_v1  ;;  %264 = vmatpush3.bf16.msra.mxu1 %v283_v6  ;;  %v232_v8 = vld [vmem:[%s486_s2] ss:$0 sm:$0xff]  ;;  %s219_s2 = sshll.u32 %s388_s11, 4  ;;  %s220_s2 = int_to_ptr.vmem [resolvable:$true] %s219_s2 }
  0x3b   :  { %257 = vmatprep.subr.bf16.mxu0 %v386_v0  ;;  %265 = vmatprep.subr.bf16.mxu1 %v386_v0  ;;  %v236_v18 = vld [vmem:[%s488_s4] ss:$0 sm:$0xff]  ;;  %s351_s12 = scalar_lea.vmem %s220_s2, 128  ;;  %p356_p11 = scmp.lt.s32.totalorder %s220_s2, %s220_s2 }
  0x3c   :  { %p352_p10 = scmp.ne.s32.totalorder %s220_s2, %s351_s12  ;;  %p357_p12 = scmp.lt.s32.totalorder %s351_s12, %s351_s12 }
  0x3e   :  { %258 = vmatpush3.bf16.msra.mxu0 %v282_v2  ;;  %266 = vmatpush3.bf16.msra.mxu1 %v284_v7  ;;  %p358_p13 = por %p357_p12, %p356_p11 }
  0x40   :  { %p359_p0 = pnand %p358_p13, %p352_p10 }
  0x41   :  { %260 = vmatmul.mubr.msk.bf16.vlgmr.msra.gmra.mrb[0].mxu0 %vm89_vm1, %v65_v5 }
 0x114   :  { %v127_v9 = vpop.f32.mrb[0].mxu0 }
 0x115   :  { %v128_v10 = vadd.f32 %v232_v8, %v127_v9  ;;  %v261_v11 = vpop.f32.mrb[1].mxu0 }
 0x116   :  { %v130_v12 = vpop.f32.mrb[2].mxu0 }
 0x117   :  { %v131_v13 = vadd.f32 %v232_v8, %v130_v12  ;;  %v262_v14 = vpop.f32.mrb[3].mxu0  ;;  %v134_v15 = vmax.f32 %v128_v10, 0.0 }
 0x119   :  { %v135_v16 = vmax.f32 %v131_v13, 0.0 }
 0x11b   :  { %v136_v17 = vpack.c.bf16 %v135_v16, %v134_v15 }
 0x11d   :  { %268 = vmatmul.mubr.msk.bf16.vlgmr.msra.gmra.mrb[0].mxu1 %vm89_vm1, %v136_v17 }
 0x1f0   :  { %v197_v19 = vpop.f32.mrb[0].mxu1 }
 0x1f1   :  { %v269_v20 = vpop.f32.mrb[1].mxu1  ;;  %v198_v22 = vadd.f32 %v236_v18, %v197_v19 }
 0x1f2   :  { %v200_v21 = vpop.f32.mrb[2].mxu1 }
 0x1f3   :  { %v201_v23 = vadd.f32 %v236_v18, %v200_v21  ;;  %v270_v24 = vpop.f32.mrb[3].mxu1 }
 0x1f5   :  { %v247_v25 = vpack.c.bf16 %v201_v23, %v198_v22 }
 0x1f7   :  { %248 = vst [vmem:[#allocation8] sm:$0xff] %v247_v25  }
 0x1f8   :  { %362 = shalt.err (!%p359_p0)
}
 0x1f9   :  { %s363_s14 = scalar_lea.hbm %s489_s5, 128 }
 0x1fa   :  { %p364_p1 = scmp.ne.s32.totalorder %s489_s5, %s363_s14  ;;  %p367_p2 = scmp.lt.u32.totalorder %s363_s14, %s489_s5 }
 0x1fc   :  { %p369_p3 = pnand %p367_p2, %p364_p1 }
 0x1fe   :  { %372 = shalt.err (!%p369_p3)
}
 0x1ff   :  { %225 = dma.vmem_to_hbm [thread:$0]  %s220_s2, 128, %s489_s5, [#allocation4], %s380_s28, %s380_s28, %s381_s29  }
 0x200   :  { %377 = dma.done.wait [#allocation4], 128  }
 0x201   :  { %378 = vsyncadd [#allocation4], 4294967168 }
 0x202   :  { %229 = vsyncpa [#allocation3], 1 }
 0x203   :  { %230 = vsyncpa [#allocation6], 1 }
 0x204   :  { %231 = vsyncpa [#allocation4], 1 }

</bundles_post_ra>
